<compile_context>
chip_gen: v6e
topology: v6e:2x2x1
jax: 0.10.0
libtpu: 0.0.40
codegen_flags: <defaults>
</compile_context>

<pallas_src>
import jax
import jax.numpy as jnp
import numpy as np
from jax import lax
from jax.experimental import pallas as pl
from jax.experimental.pallas import tpu as pltpu

DENSITY = 1.2041
MU = 1.7894e-05

D_IN = 3   # x, y, t
D_OUT = 4  # u, v, w, p
HIDDEN = 32

NUM_FIELDS = 23
_VMEM_BUDGET = 48 * 1024 * 1024   # safe on v7x (64 MiB phys) and v5e/v6e (128 MiB)


# ----------------------------------------------------------------------------
# Pallas kernel: momentum residuals + deferred reductions
# ----------------------------------------------------------------------------
def _make_kernel(n_chunks):
    """Kernel over one (F, n_chunks, SUB, cw) block with strip-mined compute."""

    def kernel(f_ref, out_ref, data_acc, phys_acc):
        inner = pl.program_id(1)

        @pl.when(inner == 0)
        def _init():
            data_acc[...] = jnp.zeros_like(data_acc)
            phys_acc[...] = jnp.zeros_like(phys_acc)

        def chunk_body(c, carry):
            def row(k):
                # (SUB, cw) slab, read lazily from the ref; compute in f32.
                return f_ref[k, c].astype(jnp.float32)

            u = row(0)
            v = row(1)
            w = row(2)

            # data loss partial: (u-ut)^2 + (v-vt)^2 + (w-wt)^2 — pure VALU
            du = u - row(3)
            dv = v - row(4)
            dw = w - row(5)
            data_acc[...] += du * du + dv * dv + dw * dw

            # momentum x: rho*(u_t + u*u_x + v*u_y) + p_x - mu*(u_xx + u_yy)
            mom_x = (DENSITY * (row(8) + u * row(6) + v * row(7))
                     + row(15) - MU * (row(17) + row(18)))
            # momentum y: rho*(v_t + u*v_x + v*v_y) + p_y - mu*(v_xx + v_yy)
            mom_y = (DENSITY * (row(11) + u * row(9) + v * row(10))
                     + row(16) - MU * (row(19) + row(20)))
            # momentum z: rho*(w_t + u*w_x + v*w_y) - mu*(w_xx + w_yy)
            mom_z = (DENSITY * (row(14) + u * row(12) + v * row(13))
                     - MU * (row(21) + row(22)))
            phys_acc[...] += mom_x * mom_x + mom_y * mom_y + mom_z * mom_z
            return carry

        # Strip-mine the large DMA block: bounds vreg pressure independent of
        # the tile width while keeping the DMA large (bandwidth lever).
        lax.fori_loop(0, n_chunks, chunk_body, None, unroll=True)

        # Single XLU reduce + single merged store, only on the last inner step.
        @pl.when(inner == pl.num_programs(1) - 1)
        def _finalize():
            data_sum = jnp.sum(data_acc[...])
            phys_sum = jnp.sum(phys_acc[...])
            lane = lax.broadcasted_iota(jnp.int32, (1, 8), 1)
            merged = jnp.where(lane == 0, data_sum,
                               jnp.where(lane == 1, phys_sum, 0.0))
            out_ref[...] = merged.reshape(1, 1, 8)

    return kernel


# ----------------------------------------------------------------------------
# Wrapper: layout, tiling, padding, normalization
# ----------------------------------------------------------------------------
def build_fields(output, target, grads):
    ug, vg, wg, pg = grads["u_grad"], grads["v_grad"], grads["w_grad"], grads["p_grad"]
    uh, vh, wh = grads["u_hessian"], grads["v_hessian"], grads["w_hessian"]
    rows = [
        output[:, 0], output[:, 1], output[:, 2],      # 0-2: u, v, w
        target[:, 0], target[:, 1], target[:, 2],      # 3-5: targets
        ug[:, 0], ug[:, 1], ug[:, 2],                  # 6-8: u_x, u_y, u_t
        vg[:, 0], vg[:, 1], vg[:, 2],                  # 9-11: v_x, v_y, v_t
        wg[:, 0], wg[:, 1], wg[:, 2],                  # 12-14: w_x, w_y, w_t
        pg[:, 0], pg[:, 1],                            # 15-16: p_x, p_y
        uh[:, 0], uh[:, 1],                            # 17-18: u_xx, u_yy
        vh[:, 0], vh[:, 1],                            # 19-20: v_xx, v_yy
        wh[:, 0], wh[:, 1],                            # 21-22: w_xx, w_yy
    ]
    return jnp.stack(rows, axis=0)                      # (23, N)


def _default_n_outer():
    """Outer-grid chunks = TensorCores per chip (1 on v5e/v6e, 2 on v4/v5p/v7x)."""
    try:
        kind = jax.devices()[0].device_kind.lower()
    except Exception:
        return 1
    if any(tag in kind for tag in ("v4", "v5p", "v7", "7x")):
        return 2
    return 1


def _round_up(x, m):
    return -(-x // m) * m


def nsloss_pallas(output, target, grads, physics_coef=1.0, *,
                  tile_cols=8192, n_outer=None, chunk_cols=512,
                  field_dtype=jnp.float32):
    """Returns (total, data, physics) like NSLoss.forward."""
    fields = build_fields(output, target, grads).astype(field_dtype)   # (23, N)
    F, N = fields.shape
    itemsize = np.dtype(field_dtype).itemsize
    sub = 16 if itemsize == 2 else 8          # native sublane tile: (8,128) f32 / (16,128) bf16

    if n_outer is None:
        n_outer = _default_n_outer()
    n_outer = max(1, int(n_outer))

    # Lane-columns per outer chunk (each column carries `sub` points).
    cols = _round_up(max(-(-N // (n_outer * sub)), 128), 128)
    tc = _round_up(min(int(tile_cols), cols), 128)

    # Clamp so the double-buffered input block fits VMEM with headroom (v7x: 64 MiB phys).
    input_budget = (_VMEM_BUDGET * 3) // 4
    max_tc = max(128, (input_budget // (2 * F * sub * itemsize)) // 128 * 128)
    tc = min(tc, max_tc)

    # Strip-mine width (register pressure); must divide tc (both multiples of 128).
    cw = max(128, (min(int(chunk_cols), tc) // 128) * 128)
    while tc % cw:
        cw -= 128
    n_chunks = tc // cw

    n_inner = -(-cols // tc)
    num_blocks = n_outer * n_inner
    n_pad = num_blocks * sub * tc             # total padded point count

    if n_pad != N:
        # Zero padding contributes exactly 0 to both squared-error sums.
        fields = jnp.pad(fields, ((0, 0), (0, n_pad - N)))

    # Block-contiguous layout: one grid step reads ONE contiguous slab of
    # shape (F, n_chunks, sub, cw).  The point->slot map is a bijection and the
    # sums are permutation-invariant, so results are unchanged.  With
    # allow_input_fusion below, XLA may fuse this stack/pad/transpose straight
    # into the pallas_call input, avoiding a separate full HBM pass.
    fields5 = fields.reshape(F, num_blocks, n_chunks, sub, cw).transpose(1, 0, 2, 3, 4)

    cost = pl.CostEstimate(
        flops=int(40 * num_blocks * sub * tc),
        transcendentals=0,
        bytes_accessed=int(F * n_pad * itemsize + n_outer * 8 * 4),
    )

    partials = pl.pallas_call(
        _make_kernel(n_chunks),
        out_shape=jax.ShapeDtypeStruct((n_outer, 1, 8), jnp.float32),
        grid_spec=pltpu.PrefetchScalarGridSpec(
            num_scalar_prefetch=0,
            grid=(n_outer, n_inner),
            in_specs=[pl.BlockSpec(
                (None, F, n_chunks, sub, cw),
                lambda o, i: (o * n_inner + i, 0, 0, 0, 0))],
            out_specs=pl.BlockSpec((1, 1, 8), lambda o, i: (o, 0, 0)),
            scratch_shapes=[pltpu.VMEM((sub, cw), jnp.float32),
                            pltpu.VMEM((sub, cw), jnp.float32)]),
        compiler_params=pltpu.CompilerParams(
            dimension_semantics=("parallel", "arbitrary"),
            allow_input_fusion=[True],
            vmem_limit_bytes=_VMEM_BUDGET),
        cost_estimate=cost,
    )(fields5)

    # Combine per-chunk raw sums; normalize with the TRUE N (not the padded N).
    data_sum = jnp.sum(partials[:, 0, 0])
    phys_sum = jnp.sum(partials[:, 0, 1])
    data = data_sum / (3.0 * N)
    phys = (phys_sum / float(N)) * physics_coef          # coef applied here: no recompile
    total = data + phys
    return total, data, phys


# ----------------------------------------------------------------------------
# Glue: deterministic synthetic PINN network + autograd-equivalent gradients
# ----------------------------------------------------------------------------
# TODO(synk): the torch.autograd.grad graph of the upstream network cannot live
# inside a Pallas kernel; derivatives are computed here with jax.grad (glue).
def init_params(key):
    k1, k2 = jax.random.split(key)
    w1 = 0.5 * jax.random.normal(k1, (D_IN, HIDDEN), jnp.float32)
    b1 = jnp.zeros((HIDDEN,), jnp.float32)
    w2 = 0.5 * jax.random.normal(k2, (HIDDEN, D_OUT), jnp.float32)
    b2 = jnp.zeros((D_OUT,), jnp.float32)
    return (w1, b1, w2, b2)


def mlp(params, x):  # x: (3,) -> (4,) = (u, v, w, p)
    w1, b1, w2, b2 = params
    h = jnp.tanh(x @ w1 + b1)
    return h @ w2 + b2


def calculate_grads(params, xs):
    """Mirrors NSLoss.calculate_grads: grad with ones grad_outputs, then
    grad-of-grad with ones grad_outputs (sum over components)."""
    def channel(k):
        scalar = lambda x: mlp(params, x)[k]
        g = jax.vmap(jax.grad(scalar))(xs)                                   # (N, 3)
        h = jax.vmap(jax.grad(lambda x: jnp.sum(jax.grad(scalar)(x))))(xs)   # (N, 3)
        return g, h

    u_g, u_h = channel(0)
    v_g, v_h = channel(1)
    w_g, w_h = channel(2)
    p_g, _ = channel(3)
    return dict(u_grad=u_g, v_grad=v_g, w_grad=w_g, p_grad=p_g,
                u_hessian=u_h, v_hessian=v_h, w_hessian=w_h)


# ----------------------------------------------------------------------------
# Pure-JAX reference (mirrors the PyTorch forward) for validation
# ----------------------------------------------------------------------------
def nsloss_ref(output, target, grads, physics_coef=1.0):
    data = jnp.mean((output[:, :3] - target) ** 2)
    u, v = output[:, 0], output[:, 1]
    ug, vg, wg, pg = grads["u_grad"], grads["v_grad"], grads["w_grad"], grads["p_grad"]
    uh, vh, wh = grads["u_hessian"], grads["v_hessian"], grads["w_hessian"]
    mx = DENSITY * (ug[:, 2] + u * ug[:, 0] + v * ug[:, 1]) + pg[:, 0] - MU * (uh[:, 0] + uh[:, 1])
    my = DENSITY * (vg[:, 2] + u * vg[:, 0] + v * vg[:, 1]) + pg[:, 1] - MU * (vh[:, 0] + vh[:, 1])
    mz = DENSITY * (wg[:, 2] + u * wg[:, 0] + v * wg[:, 1]) - MU * (wh[:, 0] + wh[:, 1])
    phys = (jnp.mean(mx ** 2) + jnp.mean(my ** 2) + jnp.mean(mz ** 2)) * physics_coef
    return data + phys, data, phys


if __name__ == "__main__":
    key = jax.random.PRNGKey(0)
    k_params, k_x, k_t = jax.random.split(key, 3)

    N = 2000  # collocation points (not a tile multiple -> exercises padding)
    params = init_params(k_params)
    xs = jax.random.normal(k_x, (N, D_IN), jnp.float32)       # input: (x, y, t)
    target = jax.random.normal(k_t, (N, 3), jnp.float32)      # target velocities

    output = jax.vmap(lambda x: mlp(params, x))(xs)           # (N, 4) = u, v, w, p
    grads = calculate_grads(params, xs)

    t_ref, d_ref, p_ref = nsloss_ref(output, target, grads, physics_coef=1.0)

    # Exercise the default config plus the structurally distinct code paths
    # (multi inner-step accumulation, strip-mined chunks, multi outer partials).
    configs = [
        dict(),                                            # defaults (auto n_outer, big tile)
        dict(n_outer=1, tile_cols=128, chunk_cols=128),    # n_inner > 1
        dict(n_outer=1, tile_cols=256, chunk_cols=128),    # n_chunks > 1
        dict(n_outer=2, tile_cols=4096),                   # multiple outer partial sums
    ]
    for cfg in configs:
        total, data, phys = nsloss_pallas(output, target, grads, physics_coef=1.0, **cfg)
        jax.block_until_ready((total, data, phys))
        np.testing.assert_allclose(np.asarray(total), np.asarray(t_ref), rtol=1e-4, atol=1e-6)
        np.testing.assert_allclose(np.asarray(data), np.asarray(d_ref), rtol=1e-4, atol=1e-6)
        np.testing.assert_allclose(np.asarray(phys), np.asarray(p_ref), rtol=1e-4, atol=1e-6)

    print("KERNEL_OK")
</pallas_src>

<mosaic_0001>
module attributes {stable_mosaic.version = 11 : i64} {
  func.func @kernel(%arg0: i32, %arg1: i32, %arg2: memref<1x23x1x8x256xf32, #tpu.memory_space<vmem>>, %arg3: memref<1x1x8xf32, #tpu.memory_space<vmem>>, %arg4: memref<8x256xf32, #tpu.memory_space<vmem>>, %arg5: memref<8x256xf32, #tpu.memory_space<vmem>>) attributes {dimension_semantics = [#tpu.dimension_semantics<parallel>, #tpu.dimension_semantics<arbitrary>], iteration_bounds = array<i64: 1, 1>, scalar_prefetch = 0 : i64, scratch_operands = 2 : i64, tpu.core_type = #tpu.core_type<tc>, window_params = [{transform_indices = @transform_0, window_bounds = array<i64: 1, 23, 1, 8, 256>}, {transform_indices = @transform_1, window_bounds = array<i64: 1, 1, 8>}]} {
    %c0_i32 = arith.constant 0 : i32
    %0 = arith.cmpi eq, %arg1, %c0_i32 : i32
    %1 = arith.extui %0 : i1 to i32
    %c0_i32_0 = arith.constant 0 : i32
    %2 = arith.cmpi ne, %1, %c0_i32_0 : i32
    scf.if %2 {
      %cst_86 = arith.constant 0.000000e+00 : f32
      %126 = vector.broadcast %cst_86 : f32 to vector<8x256xf32>
      %c0_87 = arith.constant 0 : index
      %c0_88 = arith.constant 0 : index
      %127 = vector.load %arg4[%c0_87, %c0_88] : memref<8x256xf32, #tpu.memory_space<vmem>>, vector<8x256xf32>
      tpu.vector_store %arg4[%c0_87, %c0_88], %126 {strides = array<i32>} : memref<8x256xf32, #tpu.memory_space<vmem>>, vector<8x256xf32>,
      %cst_89 = arith.constant 0.000000e+00 : f32
      %128 = vector.broadcast %cst_89 : f32 to vector<8x256xf32>
      %c0_90 = arith.constant 0 : index
      %c0_91 = arith.constant 0 : index
      %129 = vector.load %arg5[%c0_90, %c0_91] : memref<8x256xf32, #tpu.memory_space<vmem>>, vector<8x256xf32>
      tpu.vector_store %arg5[%c0_90, %c0_91], %128 {strides = array<i32>} : memref<8x256xf32, #tpu.memory_space<vmem>>, vector<8x256xf32>,
    } else {
    }
    %c0_i32_1 = arith.constant 0 : i32
    %c0 = arith.constant 0 : index
    %c0_2 = arith.constant 0 : index
    %3 = arith.index_cast %c0_i32_1 : i32 to index
    %c0_3 = arith.constant 0 : index
    %c0_4 = arith.constant 0 : index
    %4 = vector.load %arg2[%c0, %c0_2, %3, %c0_3, %c0_4] : memref<1x23x1x8x256xf32, #tpu.memory_space<vmem>>, vector<1x1x1x8x256xf32>
    %5 = vector.shape_cast %4 : vector<1x1x1x8x256xf32> to vector<8x256xf32>
    %c0_5 = arith.constant 0 : index
    %c1 = arith.constant 1 : index
    %6 = arith.index_cast %c0_i32_1 : i32 to index
    %c0_6 = arith.constant 0 : index
    %c0_7 = arith.constant 0 : index
    %7 = vector.load %arg2[%c0_5, %c1, %6, %c0_6, %c0_7] : memref<1x23x1x8x256xf32, #tpu.memory_space<vmem>>, vector<1x1x1x8x256xf32>
    %8 = vector.shape_cast %7 : vector<1x1x1x8x256xf32> to vector<8x256xf32>
    %c0_8 = arith.constant 0 : index
    %c2 = arith.constant 2 : index
    %9 = arith.index_cast %c0_i32_1 : i32 to index
    %c0_9 = arith.constant 0 : index
    %c0_10 = arith.constant 0 : index
    %10 = vector.load %arg2[%c0_8, %c2, %9, %c0_9, %c0_10] : memref<1x23x1x8x256xf32, #tpu.memory_space<vmem>>, vector<1x1x1x8x256xf32>
    %11 = vector.shape_cast %10 : vector<1x1x1x8x256xf32> to vector<8x256xf32>
    %c0_11 = arith.constant 0 : index
    %c3 = arith.constant 3 : index
    %12 = arith.index_cast %c0_i32_1 : i32 to index
    %c0_12 = arith.constant 0 : index
    %c0_13 = arith.constant 0 : index
    %13 = vector.load %arg2[%c0_11, %c3, %12, %c0_12, %c0_13] : memref<1x23x1x8x256xf32, #tpu.memory_space<vmem>>, vector<1x1x1x8x256xf32>
    %14 = vector.shape_cast %13 : vector<1x1x1x8x256xf32> to vector<8x256xf32>
    %15 = arith.subf %5, %14 : vector<8x256xf32>
    %c0_14 = arith.constant 0 : index
    %c4 = arith.constant 4 : index
    %16 = arith.index_cast %c0_i32_1 : i32 to index
    %c0_15 = arith.constant 0 : index
    %c0_16 = arith.constant 0 : index
    %17 = vector.load %arg2[%c0_14, %c4, %16, %c0_15, %c0_16] : memref<1x23x1x8x256xf32, #tpu.memory_space<vmem>>, vector<1x1x1x8x256xf32>
    %18 = vector.shape_cast %17 : vector<1x1x1x8x256xf32> to vector<8x256xf32>
    %19 = arith.subf %8, %18 : vector<8x256xf32>
    %c0_17 = arith.constant 0 : index
    %c5 = arith.constant 5 : index
    %20 = arith.index_cast %c0_i32_1 : i32 to index
    %c0_18 = arith.constant 0 : index
    %c0_19 = arith.constant 0 : index
    %21 = vector.load %arg2[%c0_17, %c5, %20, %c0_18, %c0_19] : memref<1x23x1x8x256xf32, #tpu.memory_space<vmem>>, vector<1x1x1x8x256xf32>
    %22 = vector.shape_cast %21 : vector<1x1x1x8x256xf32> to vector<8x256xf32>
    %23 = arith.subf %11, %22 : vector<8x256xf32>
    %c0_20 = arith.constant 0 : index
    %c0_21 = arith.constant 0 : index
    %24 = vector.load %arg4[%c0_20, %c0_21] : memref<8x256xf32, #tpu.memory_space<vmem>>, vector<8x256xf32>
    %25 = arith.mulf %15, %15 : vector<8x256xf32>
    %26 = arith.mulf %19, %19 : vector<8x256xf32>
    %27 = arith.addf %25, %26 : vector<8x256xf32>
    %28 = arith.mulf %23, %23 : vector<8x256xf32>
    %29 = arith.addf %27, %28 : vector<8x256xf32>
    %30 = arith.addf %24, %29 : vector<8x256xf32>
    %c0_22 = arith.constant 0 : index
    %c0_23 = arith.constant 0 : index
    %31 = vector.load %arg4[%c0_22, %c0_23] : memref<8x256xf32, #tpu.memory_space<vmem>>, vector<8x256xf32>
    tpu.vector_store %arg4[%c0_22, %c0_23], %30 {strides = array<i32>} : memref<8x256xf32, #tpu.memory_space<vmem>>, vector<8x256xf32>,
    %c0_24 = arith.constant 0 : index
    %c8 = arith.constant 8 : index
    %32 = arith.index_cast %c0_i32_1 : i32 to index
    %c0_25 = arith.constant 0 : index
    %c0_26 = arith.constant 0 : index
    %33 = vector.load %arg2[%c0_24, %c8, %32, %c0_25, %c0_26] : memref<1x23x1x8x256xf32, #tpu.memory_space<vmem>>, vector<1x1x1x8x256xf32>
    %34 = vector.shape_cast %33 : vector<1x1x1x8x256xf32> to vector<8x256xf32>
    %c0_27 = arith.constant 0 : index
    %c6 = arith.constant 6 : index
    %35 = arith.index_cast %c0_i32_1 : i32 to index
    %c0_28 = arith.constant 0 : index
    %c0_29 = arith.constant 0 : index
    %36 = vector.load %arg2[%c0_27, %c6, %35, %c0_28, %c0_29] : memref<1x23x1x8x256xf32, #tpu.memory_space<vmem>>, vector<1x1x1x8x256xf32>
    %37 = vector.shape_cast %36 : vector<1x1x1x8x256xf32> to vector<8x256xf32>
    %38 = arith.mulf %5, %37 : vector<8x256xf32>
    %39 = arith.addf %34, %38 : vector<8x256xf32>
    %c0_30 = arith.constant 0 : index
    %c7 = arith.constant 7 : index
    %40 = arith.index_cast %c0_i32_1 : i32 to index
    %c0_31 = arith.constant 0 : index
    %c0_32 = arith.constant 0 : index
    %41 = vector.load %arg2[%c0_30, %c7, %40, %c0_31, %c0_32] : memref<1x23x1x8x256xf32, #tpu.memory_space<vmem>>, vector<1x1x1x8x256xf32>
    %42 = vector.shape_cast %41 : vector<1x1x1x8x256xf32> to vector<8x256xf32>
    %43 = arith.mulf %8, %42 : vector<8x256xf32>
    %44 = arith.addf %39, %43 : vector<8x256xf32>
    %cst = arith.constant 1.204100e+00 : f32
    %45 = vector.broadcast %cst : f32 to vector<8x256xf32>
    %46 = arith.mulf %45, %44 : vector<8x256xf32>
    %c0_33 = arith.constant 0 : index
    %c15 = arith.constant 15 : index
    %47 = arith.index_cast %c0_i32_1 : i32 to index
    %c0_34 = arith.constant 0 : index
    %c0_35 = arith.constant 0 : index
    %48 = vector.load %arg2[%c0_33, %c15, %47, %c0_34, %c0_35] : memref<1x23x1x8x256xf32, #tpu.memory_space<vmem>>, vector<1x1x1x8x256xf32>
    %49 = vector.shape_cast %48 : vector<1x1x1x8x256xf32> to vector<8x256xf32>
    %50 = arith.addf %46, %49 : vector<8x256xf32>
    %c0_36 = arith.constant 0 : index
    %c17 = arith.constant 17 : index
    %51 = arith.index_cast %c0_i32_1 : i32 to index
    %c0_37 = arith.constant 0 : index
    %c0_38 = arith.constant 0 : index
    %52 = vector.load %arg2[%c0_36, %c17, %51, %c0_37, %c0_38] : memref<1x23x1x8x256xf32, #tpu.memory_space<vmem>>, vector<1x1x1x8x256xf32>
    %53 = vector.shape_cast %52 : vector<1x1x1x8x256xf32> to vector<8x256xf32>
    %c0_39 = arith.constant 0 : index
    %c18 = arith.constant 18 : index
    %54 = arith.index_cast %c0_i32_1 : i32 to index
    %c0_40 = arith.constant 0 : index
    %c0_41 = arith.constant 0 : index
    %55 = vector.load %arg2[%c0_39, %c18, %54, %c0_40, %c0_41] : memref<1x23x1x8x256xf32, #tpu.memory_space<vmem>>, vector<1x1x1x8x256xf32>
    %56 = vector.shape_cast %55 : vector<1x1x1x8x256xf32> to vector<8x256xf32>
    %57 = arith.addf %53, %56 : vector<8x256xf32>
    %cst_42 = arith.constant 1.789400e-05 : f32
    %58 = vector.broadcast %cst_42 : f32 to vector<8x256xf32>
    %59 = arith.mulf %58, %57 : vector<8x256xf32>
    %60 = arith.subf %50, %59 : vector<8x256xf32>
    %c0_43 = arith.constant 0 : index
    %c11 = arith.constant 11 : index
    %61 = arith.index_cast %c0_i32_1 : i32 to index
    %c0_44 = arith.constant 0 : index
    %c0_45 = arith.constant 0 : index
    %62 = vector.load %arg2[%c0_43, %c11, %61, %c0_44, %c0_45] : memref<1x23x1x8x256xf32, #tpu.memory_space<vmem>>, vector<1x1x1x8x256xf32>
    %63 = vector.shape_cast %62 : vector<1x1x1x8x256xf32> to vector<8x256xf32>
    %c0_46 = arith.constant 0 : index
    %c9 = arith.constant 9 : index
    %64 = arith.index_cast %c0_i32_1 : i32 to index
    %c0_47 = arith.constant 0 : index
    %c0_48 = arith.constant 0 : index
    %65 = vector.load %arg2[%c0_46, %c9, %64, %c0_47, %c0_48] : memref<1x23x1x8x256xf32, #tpu.memory_space<vmem>>, vector<1x1x1x8x256xf32>
    %66 = vector.shape_cast %65 : vector<1x1x1x8x256xf32> to vector<8x256xf32>
    %67 = arith.mulf %5, %66 : vector<8x256xf32>
    %68 = arith.addf %63, %67 : vector<8x256xf32>
    %c0_49 = arith.constant 0 : index
    %c10 = arith.constant 10 : index
    %69 = arith.index_cast %c0_i32_1 : i32 to index
    %c0_50 = arith.constant 0 : index
    %c0_51 = arith.constant 0 : index
    %70 = vector.load %arg2[%c0_49, %c10, %69, %c0_50, %c0_51] : memref<1x23x1x8x256xf32, #tpu.memory_space<vmem>>, vector<1x1x1x8x256xf32>
    %71 = vector.shape_cast %70 : vector<1x1x1x8x256xf32> to vector<8x256xf32>
    %72 = arith.mulf %8, %71 : vector<8x256xf32>
    %73 = arith.addf %68, %72 : vector<8x256xf32>
    %cst_52 = arith.constant 1.204100e+00 : f32
    %74 = vector.broadcast %cst_52 : f32 to vector<8x256xf32>
    %75 = arith.mulf %74, %73 : vector<8x256xf32>
    %c0_53 = arith.constant 0 : index
    %c16 = arith.constant 16 : index
    %76 = arith.index_cast %c0_i32_1 : i32 to index
    %c0_54 = arith.constant 0 : index
    %c0_55 = arith.constant 0 : index
    %77 = vector.load %arg2[%c0_53, %c16, %76, %c0_54, %c0_55] : memref<1x23x1x8x256xf32, #tpu.memory_space<vmem>>, vector<1x1x1x8x256xf32>
    %78 = vector.shape_cast %77 : vector<1x1x1x8x256xf32> to vector<8x256xf32>
    %79 = arith.addf %75, %78 : vector<8x256xf32>
    %c0_56 = arith.constant 0 : index
    %c19 = arith.constant 19 : index
    %80 = arith.index_cast %c0_i32_1 : i32 to index
    %c0_57 = arith.constant 0 : index
    %c0_58 = arith.constant 0 : index
    %81 = vector.load %arg2[%c0_56, %c19, %80, %c0_57, %c0_58] : memref<1x23x1x8x256xf32, #tpu.memory_space<vmem>>, vector<1x1x1x8x256xf32>
    %82 = vector.shape_cast %81 : vector<1x1x1x8x256xf32> to vector<8x256xf32>
    %c0_59 = arith.constant 0 : index
    %c20 = arith.constant 20 : index
    %83 = arith.index_cast %c0_i32_1 : i32 to index
    %c0_60 = arith.constant 0 : index
    %c0_61 = arith.constant 0 : index
    %84 = vector.load %arg2[%c0_59, %c20, %83, %c0_60, %c0_61] : memref<1x23x1x8x256xf32, #tpu.memory_space<vmem>>, vector<1x1x1x8x256xf32>
    %85 = vector.shape_cast %84 : vector<1x1x1x8x256xf32> to vector<8x256xf32>
    %86 = arith.addf %82, %85 : vector<8x256xf32>
    %cst_62 = arith.constant 1.789400e-05 : f32
    %87 = vector.broadcast %cst_62 : f32 to vector<8x256xf32>
    %88 = arith.mulf %87, %86 : vector<8x256xf32>
    %89 = arith.subf %79, %88 : vector<8x256xf32>
    %c0_63 = arith.constant 0 : index
    %c14 = arith.constant 14 : index
    %90 = arith.index_cast %c0_i32_1 : i32 to index
    %c0_64 = arith.constant 0 : index
    %c0_65 = arith.constant 0 : index
    %91 = vector.load %arg2[%c0_63, %c14, %90, %c0_64, %c0_65] : memref<1x23x1x8x256xf32, #tpu.memory_space<vmem>>, vector<1x1x1x8x256xf32>
    %92 = vector.shape_cast %91 : vector<1x1x1x8x256xf32> to vector<8x256xf32>
    %c0_66 = arith.constant 0 : index
    %c12 = arith.constant 12 : index
    %93 = arith.index_cast %c0_i32_1 : i32 to index
    %c0_67 = arith.constant 0 : index
    %c0_68 = arith.constant 0 : index
    %94 = vector.load %arg2[%c0_66, %c12, %93, %c0_67, %c0_68] : memref<1x23x1x8x256xf32, #tpu.memory_space<vmem>>, vector<1x1x1x8x256xf32>
    %95 = vector.shape_cast %94 : vector<1x1x1x8x256xf32> to vector<8x256xf32>
    %96 = arith.mulf %5, %95 : vector<8x256xf32>
    %97 = arith.addf %92, %96 : vector<8x256xf32>
    %c0_69 = arith.constant 0 : index
    %c13 = arith.constant 13 : index
    %98 = arith.index_cast %c0_i32_1 : i32 to index
    %c0_70 = arith.constant 0 : index
    %c0_71 = arith.constant 0 : index
    %99 = vector.load %arg2[%c0_69, %c13, %98, %c0_70, %c0_71] : memref<1x23x1x8x256xf32, #tpu.memory_space<vmem>>, vector<1x1x1x8x256xf32>
    %100 = vector.shape_cast %99 : vector<1x1x1x8x256xf32> to vector<8x256xf32>
    %101 = arith.mulf %8, %100 : vector<8x256xf32>
    %102 = arith.addf %97, %101 : vector<8x256xf32>
    %cst_72 = arith.constant 1.204100e+00 : f32
    %103 = vector.broadcast %cst_72 : f32 to vector<8x256xf32>
    %104 = arith.mulf %103, %102 : vector<8x256xf32>
    %c0_73 = arith.constant 0 : index
    %c21 = arith.constant 21 : index
    %105 = arith.index_cast %c0_i32_1 : i32 to index
    %c0_74 = arith.constant 0 : index
    %c0_75 = arith.constant 0 : index
    %106 = vector.load %arg2[%c0_73, %c21, %105, %c0_74, %c0_75] : memref<1x23x1x8x256xf32, #tpu.memory_space<vmem>>, vector<1x1x1x8x256xf32>
    %107 = vector.shape_cast %106 : vector<1x1x1x8x256xf32> to vector<8x256xf32>
    %c0_76 = arith.constant 0 : index
    %c22 = arith.constant 22 : index
    %108 = arith.index_cast %c0_i32_1 : i32 to index
    %c0_77 = arith.constant 0 : index
    %c0_78 = arith.constant 0 : index
    %109 = vector.load %arg2[%c0_76, %c22, %108, %c0_77, %c0_78] : memref<1x23x1x8x256xf32, #tpu.memory_space<vmem>>, vector<1x1x1x8x256xf32>
    %110 = vector.shape_cast %109 : vector<1x1x1x8x256xf32> to vector<8x256xf32>
    %111 = arith.addf %107, %110 : vector<8x256xf32>
    %cst_79 = arith.constant 1.789400e-05 : f32
    %112 = vector.broadcast %cst_79 : f32 to vector<8x256xf32>
    %113 = arith.mulf %112, %111 : vector<8x256xf32>
    %114 = arith.subf %104, %113 : vector<8x256xf32>
    %c0_80 = arith.constant 0 : index
    %c0_81 = arith.constant 0 : index
    %115 = vector.load %arg5[%c0_80, %c0_81] : memref<8x256xf32, #tpu.memory_space<vmem>>, vector<8x256xf32>
    %116 = arith.mulf %60, %60 : vector<8x256xf32>
    %117 = arith.mulf %89, %89 : vector<8x256xf32>
    %118 = arith.addf %116, %117 : vector<8x256xf32>
    %119 = arith.mulf %114, %114 : vector<8x256xf32>
    %120 = arith.addf %118, %119 : vector<8x256xf32>
    %121 = arith.addf %115, %120 : vector<8x256xf32>
    %c0_82 = arith.constant 0 : index
    %c0_83 = arith.constant 0 : index
    %122 = vector.load %arg5[%c0_82, %c0_83] : memref<8x256xf32, #tpu.memory_space<vmem>>, vector<8x256xf32>
    tpu.vector_store %arg5[%c0_82, %c0_83], %121 {strides = array<i32>} : memref<8x256xf32, #tpu.memory_space<vmem>>, vector<8x256xf32>,
    %c1_i32 = arith.constant 1 : i32
    %c0_i32_84 = arith.constant 0 : i32
    %123 = arith.cmpi eq, %arg1, %c0_i32_84 : i32
    %124 = arith.extui %123 : i1 to i32
    %c0_i32_85 = arith.constant 0 : i32
    %125 = arith.cmpi ne, %124, %c0_i32_85 : i32
    scf.if %125 {
      %c0_86 = arith.constant 0 : index
      %c0_87 = arith.constant 0 : index
      %126 = vector.load %arg4[%c0_86, %c0_87] : memref<8x256xf32, #tpu.memory_space<vmem>>, vector<8x256xf32>
      %127 = vector.shape_cast %126 : vector<8x256xf32> to vector<1x8x256xf32>
      %cst_88 = arith.constant dense<0.000000e+00> : vector<1xf32>
      %128 = vector.multi_reduction <add>, %127, %cst_88 [1, 2] : vector<1x8x256xf32> to vector<1xf32>
      %129 = vector.shape_cast %128 : vector<1xf32> to vector<1x1x1xf32>
      %130 = vector.extract %129[0, 0, 0] : f32 from vector<1x1x1xf32>
      %c0_89 = arith.constant 0 : index
      %c0_90 = arith.constant 0 : index
      %131 = vector.load %arg5[%c0_89, %c0_90] : memref<8x256xf32, #tpu.memory_space<vmem>>, vector<8x256xf32>
      %132 = vector.shape_cast %131 : vector<8x256xf32> to vector<1x8x256xf32>
      %cst_91 = arith.constant dense<0.000000e+00> : vector<1xf32>
      %133 = vector.multi_reduction <add>, %132, %cst_91 [1, 2] : vector<1x8x256xf32> to vector<1xf32>
      %134 = vector.shape_cast %133 : vector<1xf32> to vector<1x1x1xf32>
      %135 = vector.extract %134[0, 0, 0] : f32 from vector<1x1x1xf32>
      %136 = tpu.iota {dimensions = array<i32: 1>} : vector<1x8xi32>
      %c0_i32_92 = arith.constant 0 : i32
      %137 = vector.broadcast %c0_i32_92 : i32 to vector<1x8xi32>
      %138 = arith.cmpi eq, %136, %137 : vector<1x8xi32>
      %c1_i32_93 = arith.constant 1 : i32
      %139 = vector.broadcast %c1_i32_93 : i32 to vector<1x8xi32>
      %140 = arith.cmpi eq, %136, %139 : vector<1x8xi32>
      %cst_94 = arith.constant 0.000000e+00 : f32
      %141 = vector.broadcast %135 : f32 to vector<1x8xf32>
      %142 = vector.broadcast %cst_94 : f32 to vector<1x8xf32>
      %143 = arith.select %140, %141, %142 : vector<1x8xi1>, vector<1x8xf32>
      %144 = vector.broadcast %130 : f32 to vector<1x8xf32>
      %145 = arith.select %138, %144, %143 : vector<1x8xi1>, vector<1x8xf32>
      %146 = vector.shape_cast %145 : vector<1x8xf32> to vector<1x1x8xf32>
      %c0_95 = arith.constant 0 : index
      %c0_96 = arith.constant 0 : index
      %c0_97 = arith.constant 0 : index
      %147 = vector.load %arg3[%c0_95, %c0_96, %c0_97] : memref<1x1x8xf32, #tpu.memory_space<vmem>>, vector<1x1x8xf32>
      tpu.vector_store %arg3[%c0_95, %c0_96, %c0_97], %146 {strides = array<i32>} : memref<1x1x8xf32, #tpu.memory_space<vmem>>, vector<1x1x8xf32>,
    } else {
    }
    return
  }
  func.func @transform_0(%arg0: i32, %arg1: i32) -> (i32, i32, i32, i32, i32) {
    %c1_i32 = arith.constant 1 : i32
    %0 = arith.muli %arg0, %c1_i32 : i32
    %1 = arith.addi %0, %arg1 : i32
    %c0_i32 = arith.constant 0 : i32
    %c0_i32_0 = arith.constant 0 : i32
    %c0_i32_1 = arith.constant 0 : i32
    %c0_i32_2 = arith.constant 0 : i32
    %c0_i32_3 = arith.constant 0 : i32
    return %1, %c0_i32, %c0_i32_0, %c0_i32_1, %c0_i32_2 : i32, i32, i32, i32, i32
  }
  func.func @transform_1(%arg0: i32, %arg1: i32) -> (i32, i32, i32) {
    %c0_i32 = arith.constant 0 : i32
    %c0_i32_0 = arith.constant 0 : i32
    %c0_i32_1 = arith.constant 0 : i32
    return %arg0, %c0_i32, %c0_i32_0 : i32, i32, i32
  }
}

</mosaic_0001>

<bundles_post_ra>
// kernel: tpu_custom_call.1
= control target key start
LH: loop header
LB: loop body
LE: loop exit
PB: predicated region body
PF: predicated region fallthrough
CT: control target
= control target key end

     0   :  { %6 = vsyncpa [#allocation5], 0  ;;  %s342_s0 = inlined_call_operand.hbm [shape: f32[1,23,1,8,256], index: 0, kind: input, shape index: {}]   ;;  %s343_s1 = inlined_call_operand.hbm [shape: f32[1,1,8], index: 1, kind: output, shape index: {}]  }
   0x1   :  { %7 = vsyncpa [#allocation6], 0  ;;  %s298_s6 = smov [#allocation4]  }
   0x2   :  { %s17_s7 = sshll.u32 %s298_s6, 4  ;;  %s18_s7 = int_to_ptr.vmem [resolvable:$true] %s17_s7 }
   0x3   :  { %s262_s8 = scalar_lea.vmem %s18_s7, 5888  ;;  %p267_p1 = scmp.lt.s32.totalorder %s18_s7, %s18_s7 }
   0x4   :  { %p263_p0 = scmp.ne.s32.totalorder %s18_s7, %s262_s8  ;;  %p268_p2 = scmp.lt.s32.totalorder %s262_s8, %s262_s8 }
   0x6   :  { %p269_p3 = por %p268_p2, %p267_p1 }
   0x8   :  { %p270_p4 = pnand %p269_p3, %p263_p0 }
   0xa   :  { %273 = shalt.err (!%p270_p4)
}
   0xb   :  { %s299_s9 = smov 256   ;;  %s300_s10 = smov 16  }
   0xc   :  { %23 = dma.hbm_to_vmem [thread:$0]  %s342_s0, 5888, %s18_s7, [#allocation5], %s299_s9, %s299_s9, %s300_s10  }
   0xd   :  { %294 = dma.done.wait [#allocation5], 5888  }
   0xe   :  { %295 = vsyncadd [#allocation5], 4294961408  ;;  %v315_v0 = vld [vmem:[#allocation4] sm:$0xff]  ;;  %v317_v1 = vld [vmem:[#allocation4 + $0x8] sm:$0xff]  ;;  %s301_s13 = smov [#allocation7]   ;;  %vm229_vm2 = vcmask 57344  }
   0xf   :  { %v319_v2 = vld [vmem:[#allocation4 + $0x10] sm:$0xff]  ;;  %v321_v3 = vld [vmem:[#allocation4 + $0x18] sm:$0xff]  ;;  %v42_v4 = vld [vmem:[#allocation4 + $0x20] sm:$0xff]  ;;  %s237_s14 = sshll.u32 %s301_s13, 4  ;;  %s238_s14 = int_to_ptr.vmem [resolvable:$true] %s237_s14 }
  0x10   :  { %v43_v5 = vld [vmem:[#allocation4 + $0x28] sm:$0xff]  ;;  %v45_v6 = vld [vmem:[#allocation4 + $0x30] sm:$0xff]  ;;  %v46_v7 = vld [vmem:[#allocation4 + $0x38] sm:$0xff]  ;;  %s274_s16 = scalar_lea.vmem %s238_s14, 16  ;;  %s278_s17 = scalar_lea.vmem %s238_s14, 32 }
  0x11   :  { %v50_v8 = vld [vmem:[#allocation4 + $0x40] sm:$0xff]  ;;  %v47_v9 = vsub.f32 %v315_v0, %v45_v6  ;;  %v48_v10 = vsub.f32 %v317_v1, %v46_v7  ;;  %v51_v11 = vld [vmem:[#allocation4 + $0x48] sm:$0xff]  ;;  %v55_v13 = vld [vmem:[#allocation4 + $0x50] sm:$0xff]  ;;  %p275_p5 = scmp.ne.s32.totalorder %s238_s14, %s274_s16  ;;  %p279_p6 = scmp.lt.s32.totalorder %s238_s14, %s238_s14 }
  0x12   :  { %v52_v12 = vsub.f32 %v319_v2, %v50_v8  ;;  %v56_v14 = vld [vmem:[#allocation4 + $0x58] sm:$0xff]  ;;  %v53_v15 = vsub.f32 %v321_v3, %v51_v11  ;;  %v57_v16 = vsub.f32 %v42_v4, %v55_v13  ;;  %v79_v18 = vld [vmem:[#allocation4 + $0x60] sm:$0xff]  ;;  %v80_v19 = vld [vmem:[#allocation4 + $0x68] sm:$0xff]  ;;  %p280_p7 = scmp.lt.s32.totalorder %s278_s17, %s274_s16 }
  0x13   :  { %v58_v17 = vsub.f32 %v43_v5, %v56_v14  ;;  %v115_v20 = vld [vmem:[#allocation4 + $0x90] sm:$0xff]  ;;  %v61_v21 = vmul.f32 %v47_v9, %v47_v9  ;;  %v62_v22 = vmul.f32 %v48_v10, %v48_v10  ;;  %v81_v24 = vmul.f32 %v79_v18, %v315_v0  ;;  %v116_v25 = vld [vmem:[#allocation4 + $0x98] sm:$0xff]  ;;  %v76_v26 = vld [vmem:[#allocation4 + $0x80] sm:$0xff] }
  0x14   :  { %v63_v23 = vmul.f32 %v52_v12, %v52_v12  ;;  %v77_v27 = vld [vmem:[#allocation4 + $0x88] sm:$0xff]  ;;  %v64_v28 = vmul.f32 %v53_v15, %v53_v15  ;;  %v67_v29 = vmul.f32 %v57_v16, %v57_v16  ;;  %v82_v31 = vmul.f32 %v80_v19, %v317_v1  ;;  %v86_v32 = vld [vmem:[#allocation4 + $0x70] sm:$0xff]  ;;  %v87_v33 = vld [vmem:[#allocation4 + $0x78] sm:$0xff]  ;;  %p281_p8 = por %p280_p7, %p279_p6 }
  0x15   :  { %v68_v30 = vmul.f32 %v58_v17, %v58_v17  ;;  %v117_v35 = vmul.f32 %v115_v20, %v315_v0  ;;  %v118_v36 = vmul.f32 %v116_v25, %v317_v1  ;;  %v83_v37 = vadd.f32 %v81_v24, %v76_v26  ;;  %v100_v38 = vld [vmem:[#allocation4 + $0x110] sm:$0xff]  ;;  %v101_v39 = vld [vmem:[#allocation4 + $0x118] sm:$0xff]  ;;  %v103_v44 = vld [vmem:[#allocation4 + $0x120] sm:$0xff] }
  0x16   :  { %v65_v34 = vadd.f32 %v63_v23, %v61_v21  ;;  %v66_v40 = vadd.f32 %v64_v28, %v62_v22  ;;  %v84_v41 = vadd.f32 %v82_v31, %v77_v27  ;;  %v88_v42 = vmul.f32 %v86_v32, %v319_v2  ;;  %v104_v45 = vld [vmem:[#allocation4 + $0x128] sm:$0xff]  ;;  %v112_v46 = vld [vmem:[#allocation4 + $0xb0] sm:$0xff]  ;;  %v113_v50 = vld [vmem:[#allocation4 + $0xb8] sm:$0xff]  ;;  %p282_p9 = pnand %p281_p8, %p275_p5 }
  0x17   :  { %v89_v43 = vmul.f32 %v87_v33, %v321_v3  ;;  %v105_v48 = vadd.f32 %v103_v44, %v100_v38  ;;  %v106_v49 = vadd.f32 %v104_v45, %v101_v39  ;;  %v119_v51 = vadd.f32 %v117_v35, %v112_v46  ;;  %v122_v52 = vld [vmem:[#allocation4 + $0xa0] sm:$0xff]  ;;  %v123_v53 = vld [vmem:[#allocation4 + $0xa8] sm:$0xff]  ;;  %v95_v57 = vld [vmem:[#allocation4 + $0xf0] sm:$0xff] }
  0x18   :  { %v69_v47 = vadd.f32 %v67_v29, %v65_v34  ;;  %v70_v54 = vadd.f32 %v68_v30, %v66_v40  ;;  %v90_v55 = vadd.f32 %v88_v42, %v83_v37  ;;  %v96_v58 = vld [vmem:[#allocation4 + $0xf8] sm:$0xff]  ;;  %v120_v59 = vadd.f32 %v118_v36, %v113_v50  ;;  %v136_v60 = vld [vmem:[#allocation4 + $0x130] sm:$0xff]  ;;  %v139_v6 = vld [vmem:[#allocation4 + $0x140] sm:$0xff] }
  0x19   :  { %v91_v56 = vadd.f32 %v89_v43, %v84_v41  ;;  %v107_v61 = vmul.f32 1.7894e-05, %v105_v48  ;;  %v108_v62 = vmul.f32 1.7894e-05, %v106_v49  ;;  %v124_v63 = vmul.f32 %v122_v52, %v319_v2  ;;  %v137_v5 = vld [vmem:[#allocation4 + $0x138] sm:$0xff]  ;;  %v131_v10 = vld [vmem:[#allocation4 + $0x100] sm:$0xff] }
  0x1a   :  { %v125_v4 = vmul.f32 %v123_v53, %v321_v3  ;;  %v199_v7 = vadd.f32 %v70_v54, %v69_v47  ;;  %v92_v8 = vmul.f32 1.2041, %v90_v55  ;;  %v132_v11 = vld [vmem:[#allocation4 + $0x108] sm:$0xff]  ;;  %v141_v13 = vadd.f32 %v139_v6, %v136_v60  ;;  %v148_v14 = vld [vmem:[#allocation4 + $0xe0] sm:$0xff]  ;;  %v158_v25 = vld [vmem:[#allocation4 + $0xd0] sm:$0xff] }
  0x1b   :  { %v93_v9 = vmul.f32 1.2041, %v91_v56  ;;  %v140_v12 = vld [vmem:[#allocation4 + $0x148] sm:$0xff]  ;;  %v126_v15 = vadd.f32 %v124_v63, %v119_v51  ;;  %v151_v19 = vld [vmem:[#allocation4 + $0xc0] sm:$0xff]  ;;  %v159_v26 = vld [vmem:[#allocation4 + $0xd8] sm:$0xff]  ;;  %v160_v35 = vmul.f32 %v158_v25, %v319_v2 }
  0x1c   :  { %v127_v16 = vadd.f32 %v125_v4, %v120_v59  ;;  %v142_v17 = vadd.f32 %v140_v12, %v137_v5  ;;  %v149_v18 = vld [vmem:[#allocation4 + $0xe8] sm:$0xff]  ;;  %200 = vadd.xlane.f32.xlu0 %v199_v7  ;;  %v97_v21 = vadd.f32 %v95_v57, %v92_v8  ;;  %v143_v23 = vmul.f32 1.7894e-05, %v141_v13  ;;  %v167_v27 = vld [vmem:[#allocation4 + $0x150] sm:$0xff]  ;;  %v168_v36 = vld [vmem:[#allocation4 + $0x158] sm:$0xff] }
  0x1d   :  { %v152_v20 = vld [vmem:[#allocation4 + $0xc8] sm:$0xff]  ;;  %v98_v22 = vadd.f32 %v96_v58, %v93_v9  ;;  %v153_v24 = vmul.f32 %v151_v19, %v315_v0  ;;  %v128_v28 = vmul.f32 1.2041, %v126_v15  ;;  %v170_v37 = vld [vmem:[#allocation4 + $0x160] sm:$0xff]  ;;  %v161_v0 = vmul.f32 %v159_v26, %v321_v3 }
  0x1e   :  { %v129_v29 = vmul.f32 1.2041, %v127_v16  ;;  %v144_v30 = vmul.f32 1.7894e-05, %v142_v17  ;;  %v154_v31 = vmul.f32 %v152_v20, %v317_v1  ;;  %v109_v32 = vsub.f32 %v97_v21, %v107_v61  ;;  %v171_v38 = vld [vmem:[#allocation4 + $0x168] sm:$0xff] }
  0x1f   :  { %v110_v33 = vsub.f32 %v98_v22, %v108_v62  ;;  %v155_v34 = vadd.f32 %v153_v24, %v148_v14  ;;  %v133_v39 = vadd.f32 %v131_v10, %v128_v28  ;;  %v172_v43 = vadd.f32 %v170_v37, %v167_v27 }
  0x20   :  { %v134_v40 = vadd.f32 %v132_v11, %v129_v29  ;;  %v156_v41 = vadd.f32 %v154_v31, %v149_v18  ;;  %v173_v44 = vadd.f32 %v171_v38, %v168_v36  ;;  %v180_v45 = vmul.f32 %v109_v32, %v109_v32 }
  0x21   :  { %v162_v42 = vadd.f32 %v160_v35, %v155_v34  ;;  %v145_v46 = vsub.f32 %v133_v39, %v143_v23  ;;  %v181_v48 = vmul.f32 %v110_v33, %v110_v33  ;;  %v174_v50 = vmul.f32 1.7894e-05, %v172_v43 }
  0x22   :  { %v146_v47 = vsub.f32 %v134_v40, %v144_v30  ;;  %v163_v1 = vadd.f32 %v161_v0, %v156_v41  ;;  %v175_v51 = vmul.f32 1.7894e-05, %v173_v44  ;;  %v221_v16 = vlaneseq }
  0x23   :  { %v164_v49 = vmul.f32 1.2041, %v162_v42  ;;  %v182_v52 = vmul.f32 %v145_v46, %v145_v46 }
  0x24   :  { %v165_v2 = vmul.f32 1.2041, %v163_v1  ;;  %v183_v53 = vmul.f32 %v146_v47, %v146_v47  ;;  %v222_v17 = vand.u32 127, %v221_v16 }
  0x25   :  { %v176_v54 = vsub.f32 %v164_v49, %v174_v50  ;;  %v184_v56 = vadd.f32 %v182_v52, %v180_v45 }
  0x26   :  { %v177_v55 = vsub.f32 %v165_v2, %v175_v51  ;;  %v185_v57 = vadd.f32 %v183_v53, %v181_v48  ;;  %vm224_vm0 = vcmp.eq.s32.totalorder %v222_v17, 1  ;;  %vm223_vm1 = vcmp.eq.s32.totalorder %v222_v17, 0 }
  0x27   :  { %v186_v58 = vmul.f32 %v176_v54, %v176_v54 }
  0x28   :  { %v187_v3 = vmul.f32 %v177_v55, %v177_v55 }
  0x29   :  { %v188_v59 = vadd.f32 %v186_v58, %v184_v56 }
  0x2a   :  { %v189_v60 = vadd.f32 %v187_v3, %v185_v57 }
  0x2c   :  { %v211_v61 = vadd.f32 %v189_v60, %v188_v59 }
  0x2e   :  { %212 = vadd.xlane.f32.xlu0 %v211_v61 }
  0xa5   :  { %v201_v62 = vpop.xlane.xlu0 %200 }
  0xa6   :  { %v202_v63 = vrot.slane %v201_v62, 4 }
  0xa8   :  { %v203_v4 = vadd.f32 %v202_v63, %v201_v62 }
  0xaa   :  { %v204_v5 = vrot.slane %v203_v4, 2 }
  0xac   :  { %v205_v6 = vadd.f32 %v204_v5, %v203_v4 }
  0xae   :  { %v206_v7 = vrot.slane %v205_v6, 1 }
  0xb0   :  { %v207_v8 = vadd.f32 %v206_v7, %v205_v6 }
  0xb2   :  { %246 = vpush %v207_v8 }
  0xb7   :  { %v213_v9 = vpop.xlane.xlu0 %212 }
  0xb8   :  { %v214_v10 = vrot.slane %v213_v9, 4 }
  0xba   :  { %v215_v11 = vadd.f32 %v214_v10, %v213_v9 }
  0xbc   :  { %v216_v12 = vrot.slane %v215_v11, 2 }
  0xbe   :  { %v217_v13 = vadd.f32 %v216_v12, %v215_v11 }
  0xc0   :  { %v218_v14 = vrot.slane %v217_v13, 1 }
  0xc2   :  { %v219_v15 = vadd.f32 %v218_v14, %v217_v13 }
  0xc4   :  { %248 = vpush %v219_v15 }
  0xe3   :  { %s247_s0 = spop %246 }
  0xe4   :  { %v227_v19 = vstv %s247_s0 }
  0xf5   :  { %s249_s15 = spop %248 }
  0xf6   :  { %v225_v18 = vstv %s249_s15 }
  0xf7   :  { %v226_v20 = vsel %vm224_vm0, %v225_v18, 0.0 }
  0xf8   :  { %v228_v21 = vsel %vm223_vm1, %v227_v19, %v226_v20 }
  0xf9   :  { %230 = vst.msk [vmem:[#allocation7] sm:$0x1] %vm229_vm2, %v228_v21 }
  0xfa   :  { %285 = shalt.err (!%p282_p9)
}
  0xfb   :  { %240 = dma.vmem_to_hbm [thread:$0]  %s238_s14, 16, %s343_s1, [#allocation6]  }
  0xfc   :  { %296 = dma.done.wait [#allocation6], 16  }
  0xfd   :  { %297 = vsyncadd [#allocation6], 4294967280 }
  0xfe   :  { %244 = vsyncpa [#allocation5], 1 }
  0xff   :  { %245 = vsyncpa [#allocation6], 1 }

</bundles_post_ra>
